<compile_context>
chip_gen: v7x
topology: tpu7x:2x2x1
jax: 0.10.0
libtpu: 0.0.40
codegen_flags: <defaults>
</compile_context>

<pallas_src>
import functools

import jax
import jax.numpy as jnp
from jax.experimental import pallas as pl
from jax.experimental.pallas import tpu as pltpu


def _round_up(x, m):
    return ((x + m - 1) // m) * m


def _vmem_capacity_bytes():
    """Physical VMEM of the local chip (conservative fallback = v7x's 64 MiB)."""
    try:
        cap = getattr(pltpu.get_tpu_info(), "vmem_capacity_bytes", None)
        if cap:
            return int(cap)
    except Exception:
        pass
    return 64 * 1024 * 1024


def _fused_mlp_kernel(*refs, num_layers, has_bias):
    """refs = (x_ref, [w_i, (b_i if has_bias[i])] * num_layers, o_ref).

    x_ref: [tm, D0]; w_i: [D_i, D_{i+1}]; b_i: [1, D_{i+1}]; o_ref: [tm, D_L].
    The whole layer chain runs on the MXU with f32 accumulation; intermediate
    activations never leave vregs/VMEM.
    """
    it = iter(refs)
    h = next(it)[...]                              # [tm, d_in] activation
    for i in range(num_layers):
        w = next(it)[...]                          # resident weight block
        y = jnp.dot(h.astype(w.dtype), w, preferred_element_type=jnp.float32)
        if has_bias[i]:
            y = y + next(it)[...].astype(jnp.float32)
        if i < num_layers - 1:
            y = jnp.maximum(y, 0.0)                # ReLU on all but the last layer
        h = y
    o_ref = next(it)
    o_ref[...] = h.astype(o_ref.dtype)


def fused_mlp(x2d, packed_params, *, vmem_budget_bytes=None):
    """x2d: [B, D_in]; packed_params: list of (w [in,out], b [1,out] or None)."""
    B, d_in = x2d.shape
    dtype = x2d.dtype
    num_layers = len(packed_params)
    out_dim = packed_params[-1][0].shape[1]
    has_bias = tuple(b is not None for _, b in packed_params)

    # ---- VMEM budget -> batch-tile size ------------------------------------
    if vmem_budget_bytes is None:
        # ~75% of physical VMEM, capped (v7x: 64 MiB phys -> 48 MiB budget;
        # v5e/v6e: 128 MiB phys -> 96-100 MiB budget).
        vmem_budget_bytes = min(_vmem_capacity_bytes() * 3 // 4, 100 * 1024 * 1024)

    weight_bytes = 0
    widest = d_in
    for w, b in packed_params:
        weight_bytes += w.size * w.dtype.itemsize
        if b is not None:
            weight_bytes += b.size * b.dtype.itemsize
        widest = max(widest, w.shape[1])

    # Per-batch-row VMEM: double-buffered input + output tiles plus the widest
    # f32 intermediate (counted twice for temporaries). Weights budgeted as
    # double-buffered so the fallback path is also safe.
    row_bytes = 2 * (d_in + out_dim) * x2d.dtype.itemsize + 2 * widest * 4
    tm_budget = (vmem_budget_bytes - 2 * weight_bytes) // max(row_bytes, 1)
    tm_cap = int(max(8, min(tm_budget, 1024)))

    if B <= 8:
        tm = B                      # single tile; block dim == full dim is legal
    else:
        # >= 2 tiles so both v7x TensorCores get work; tiles stay 8-aligned.
        tm = min(_round_up(pl.cdiv(B, 2), 8), _round_up(tm_cap, 8))
    grid_m = pl.cdiv(B, tm)

    # ---- cost hint for the XLA scheduler ------------------------------------
    flops = 2 * B * sum(w.shape[0] * w.shape[1] for w, _ in packed_params)
    bytes_accessed = (x2d.size * x2d.dtype.itemsize + weight_bytes
                      + B * out_dim * jnp.dtype(dtype).itemsize)
    cost = pl.CostEstimate(flops=flops, transcendentals=0,
                           bytes_accessed=bytes_accessed)

    kernel = functools.partial(_fused_mlp_kernel, num_layers=num_layers,
                               has_bias=has_bias)

    def _call(single_buffer_weights):
        def resident(shape):
            # Constant index_map -> the block never changes across grid steps;
            # single-buffer it so big weights don't eat 2x VMEM.
            idx_map = lambda i: (0,) * len(shape)
            if single_buffer_weights:
                return pl.BlockSpec(shape, idx_map, pipeline_mode=pl.Buffered(1))
            return pl.BlockSpec(shape, idx_map)

        inputs = [x2d]
        in_specs = [pl.BlockSpec((tm, d_in), lambda i: (i, 0))]
        for w, b in packed_params:
            inputs.append(w)
            in_specs.append(resident(w.shape))
            if b is not None:
                inputs.append(b)
                in_specs.append(resident(b.shape))

        return pl.pallas_call(
            kernel,
            out_shape=jax.ShapeDtypeStruct((B, out_dim), dtype),
            grid=(grid_m,),
            in_specs=in_specs,
            out_specs=pl.BlockSpec((tm, out_dim), lambda i: (i, 0)),
            compiler_params=pltpu.CompilerParams(
                dimension_semantics=("parallel",),   # shard batch tiles across TCs
                vmem_limit_bytes=int(vmem_budget_bytes),
            ),
            cost_estimate=cost,
        )(*inputs)

    try:
        return _call(True)
    except Exception:
        # pipeline_mode / Buffered(1) unsupported on this jax build: fall back to
        # default double-buffered resident weights (identical math).
        return _call(False)
    # TODO(synk): for very large D_in / hidden dims add a K-reduction grid axis
    # (last, "arbitrary") with a resident f32 VMEM accumulator instead of loading
    # each full weight as one resident block.


def init_mlp_params(key, input_dim, hidden_dim_list, output_dim, use_bias=False):
    """Deterministic init mirroring the nn.Linear shapes of `mlp` (w as [in, out])."""
    dims = [input_dim] + list(hidden_dim_list) + [output_dim]
    # First layer: bias (nn.Linear default); middle layers: use_bias; last: no bias.
    has_bias = [True] + [use_bias] * (len(hidden_dim_list) - 1) + [False]
    params = []
    for i in range(len(dims) - 1):
        d_in, d_out = dims[i], dims[i + 1]
        key, kw, kb = jax.random.split(key, 3)
        bound = 1.0 / jnp.sqrt(d_in)
        w = jax.random.uniform(kw, (d_in, d_out), jnp.float32, -bound, bound)
        b = (jax.random.uniform(kb, (d_out,), jnp.float32, -bound, bound)
             if has_bias[i] else None)
        params.append((w, b))
    return params


def pack_mlp_params(params, weight_dtype=jnp.float32):
    """One-time packing, hoisted out of the per-call path.

    Weights stay [in, out] for direct MXU consumption; biases become [1, out]
    rows. Pass weight_dtype=jnp.bfloat16 for the v6e/v7x MXU fast path (the
    kernel still accumulates in f32).
    """
    packed = []
    for w, b in params:
        wp = jnp.asarray(w, weight_dtype)
        bp = None if b is None else jnp.asarray(b, jnp.float32).reshape(1, -1)
        packed.append((wp, bp))
    return packed


def mlp_forward(packed_params, x):
    # Flatten [B, C, H, W] -> [B, C*H*W] (row-major, same as torch .view).
    feats = x.reshape(x.shape[0], -1)
    return fused_mlp(feats, packed_params)


def _reference_forward(params, x):
    feats = x.reshape(x.shape[0], -1)
    for i, (w, b) in enumerate(params):
        feats = feats @ w
        if b is not None:
            feats = feats + b
        if i < len(params) - 1:
            feats = jnp.maximum(feats, 0.0)
    return feats


if __name__ == "__main__":
    key = jax.random.PRNGKey(0)
    kx, kp = jax.random.split(key)

    B, C, H, W = 2, 4, 16, 16
    input_dim = C * H * W
    hidden_dim_list = [32, 32]
    output_dim = 8

    x = jax.random.normal(kx, (B, C, H, W), jnp.float32)
    params = init_mlp_params(kp, input_dim, hidden_dim_list, output_dim,
                             use_bias=False)
    packed = pack_mlp_params(params)        # one-time; keep f32 for exact check

    out = mlp_forward(packed, x)
    jax.block_until_ready(out)
    assert out.shape == (B, output_dim)

    ref = _reference_forward(params, x)
    assert jnp.allclose(out, ref, rtol=1e-5, atol=1e-5), "mismatch vs. reference"

    print("KERNEL_OK")
</pallas_src>

<mosaic_0001>
module attributes {stable_mosaic.version = 11 : i64} {
  func.func @_fused_mlp_kernel(%arg0: i32, %arg1: memref<2x1024xf32, #tpu.memory_space<vmem>>, %arg2: memref<1024x32xf32, #tpu.memory_space<vmem>>, %arg3: memref<1x32xf32, #tpu.memory_space<vmem>>, %arg4: memref<32x32xf32, #tpu.memory_space<vmem>>, %arg5: memref<32x8xf32, #tpu.memory_space<vmem>>, %arg6: memref<2x8xf32, #tpu.memory_space<vmem>>) attributes {dimension_semantics = [#tpu.dimension_semantics<parallel>], iteration_bounds = array<i64: 1>, scalar_prefetch = 0 : i64, scratch_operands = 0 : i64, tpu.core_type = #tpu.core_type<tc>, window_params = [{transform_indices = @transform_0, window_bounds = array<i64: 2, 1024>}, {pipeline_mode = #tpu.pipeline_mode<synchronous>, transform_indices = @transform_1, window_bounds = array<i64: 1024, 32>}, {pipeline_mode = #tpu.pipeline_mode<synchronous>, transform_indices = @transform_2, window_bounds = array<i64: 1, 32>}, {pipeline_mode = #tpu.pipeline_mode<synchronous>, transform_indices = @transform_3, window_bounds = array<i64: 32, 32>}, {pipeline_mode = #tpu.pipeline_mode<synchronous>, transform_indices = @transform_4, window_bounds = array<i64: 32, 8>}, {transform_indices = @transform_5, window_bounds = array<i64: 2, 8>}]} {
    %c0 = arith.constant 0 : index
    %c0_0 = arith.constant 0 : index
    %0 = vector.load %arg1[%c0, %c0_0] : memref<2x1024xf32, #tpu.memory_space<vmem>>, vector<2x1024xf32>
    %c0_1 = arith.constant 0 : index
    %c0_2 = arith.constant 0 : index
    %1 = vector.load %arg2[%c0_1, %c0_2] : memref<1024x32xf32, #tpu.memory_space<vmem>>, vector<1024x32xf32>
    %cst = arith.constant dense<0.000000e+00> : vector<2x32xf32>
    %2 = tpu.matmul %0, %1, %cst {dimension_numbers = #tpu.dot_dimension_numbers<[1], [0], [0], [1], [0, 0, 1, 1], [], []>} : vector<2x1024xf32>, vector<1024x32xf32>, vector<2x32xf32> -> vector<2x32xf32>
    %c0_3 = arith.constant 0 : index
    %c0_4 = arith.constant 0 : index
    %3 = vector.load %arg3[%c0_3, %c0_4] : memref<1x32xf32, #tpu.memory_space<vmem>>, vector<1x32xf32>
    %4 = vector.broadcast %3 : vector<1x32xf32> to vector<2x32xf32>
    %5 = arith.addf %2, %4 : vector<2x32xf32>
    %cst_5 = arith.constant 0.000000e+00 : f32
    %6 = vector.broadcast %cst_5 : f32 to vector<2x32xf32>
    %7 = arith.maximumf %5, %6 : vector<2x32xf32>
    %c0_6 = arith.constant 0 : index
    %c0_7 = arith.constant 0 : index
    %8 = vector.load %arg4[%c0_6, %c0_7] : memref<32x32xf32, #tpu.memory_space<vmem>>, vector<32x32xf32>
    %cst_8 = arith.constant dense<0.000000e+00> : vector<2x32xf32>
    %9 = tpu.matmul %7, %8, %cst_8 {dimension_numbers = #tpu.dot_dimension_numbers<[1], [0], [0], [1], [0, 0, 1, 1], [], []>} : vector<2x32xf32>, vector<32x32xf32>, vector<2x32xf32> -> vector<2x32xf32>
    %cst_9 = arith.constant 0.000000e+00 : f32
    %10 = vector.broadcast %cst_9 : f32 to vector<2x32xf32>
    %11 = arith.maximumf %9, %10 : vector<2x32xf32>
    %c0_10 = arith.constant 0 : index
    %c0_11 = arith.constant 0 : index
    %12 = vector.load %arg5[%c0_10, %c0_11] : memref<32x8xf32, #tpu.memory_space<vmem>>, vector<32x8xf32>
    %cst_12 = arith.constant dense<0.000000e+00> : vector<2x8xf32>
    %13 = tpu.matmul %11, %12, %cst_12 {dimension_numbers = #tpu.dot_dimension_numbers<[1], [0], [0], [1], [0, 0, 1, 1], [], []>} : vector<2x32xf32>, vector<32x8xf32>, vector<2x8xf32> -> vector<2x8xf32>
    %c0_13 = arith.constant 0 : index
    %c0_14 = arith.constant 0 : index
    %14 = vector.load %arg6[%c0_13, %c0_14] : memref<2x8xf32, #tpu.memory_space<vmem>>, vector<2x8xf32>
    tpu.vector_store %arg6[%c0_13, %c0_14], %13 {strides = array<i32>} : memref<2x8xf32, #tpu.memory_space<vmem>>, vector<2x8xf32>,
    return
  }
  func.func @transform_0(%arg0: i32) -> (i32, i32) {
    %c0_i32 = arith.constant 0 : i32
    %c0_i32_0 = arith.constant 0 : i32
    return %arg0, %c0_i32 : i32, i32
  }
  func.func @transform_1(%arg0: i32) -> (i32, i32) {
    %c0_i32 = arith.constant 0 : i32
    %c0_i32_0 = arith.constant 0 : i32
    %c0_i32_1 = arith.constant 0 : i32
    return %c0_i32, %c0_i32_0 : i32, i32
  }
  func.func @transform_2(%arg0: i32) -> (i32, i32) {
    %c0_i32 = arith.constant 0 : i32
    %c0_i32_0 = arith.constant 0 : i32
    %c0_i32_1 = arith.constant 0 : i32
    return %c0_i32, %c0_i32_0 : i32, i32
  }
  func.func @transform_3(%arg0: i32) -> (i32, i32) {
    %c0_i32 = arith.constant 0 : i32
    %c0_i32_0 = arith.constant 0 : i32
    %c0_i32_1 = arith.constant 0 : i32
    return %c0_i32, %c0_i32_0 : i32, i32
  }
  func.func @transform_4(%arg0: i32) -> (i32, i32) {
    %c0_i32 = arith.constant 0 : i32
    %c0_i32_0 = arith.constant 0 : i32
    %c0_i32_1 = arith.constant 0 : i32
    return %c0_i32, %c0_i32_0 : i32, i32
  }
  func.func @transform_5(%arg0: i32) -> (i32, i32) {
    %c0_i32 = arith.constant 0 : i32
    %c0_i32_0 = arith.constant 0 : i32
    return %arg0, %c0_i32 : i32, i32
  }
}

module attributes {stable_mosaic.version = 11 : i64} {
  func.func @_fused_mlp_kernel(%arg0: i32, %arg1: memref<2x1024xf32, #tpu.memory_space<vmem>>, %arg2: memref<1024x32xf32, #tpu.memory_space<vmem>>, %arg3: memref<1x32xf32, #tpu.memory_space<vmem>>, %arg4: memref<32x32xf32, #tpu.memory_space<vmem>>, %arg5: memref<32x8xf32, #tpu.memory_space<vmem>>, %arg6: memref<2x8xf32, #tpu.memory_space<vmem>>) attributes {dimension_semantics = [#tpu.dimension_semantics<parallel>], iteration_bounds = array<i64: 1>, scalar_prefetch = 0 : i64, scratch_operands = 0 : i64, tpu.core_type = #tpu.core_type<tc>, window_params = [{transform_indices = @transform_0, window_bounds = array<i64: 2, 1024>}, {pipeline_mode = #tpu.pipeline_mode<synchronous>, transform_indices = @transform_1, window_bounds = array<i64: 1024, 32>}, {pipeline_mode = #tpu.pipeline_mode<synchronous>, transform_indices = @transform_2, window_bounds = array<i64: 1, 32>}, {pipeline_mode = #tpu.pipeline_mode<synchronous>, transform_indices = @transform_3, window_bounds = array<i64: 32, 32>}, {pipeline_mode = #tpu.pipeline_mode<synchronous>, transform_indices = @transform_4, window_bounds = array<i64: 32, 8>}, {transform_indices = @transform_5, window_bounds = array<i64: 2, 8>}]} {
    %c0 = arith.constant 0 : index
    %c0_0 = arith.constant 0 : index
    %0 = vector.load %arg1[%c0, %c0_0] : memref<2x1024xf32, #tpu.memory_space<vmem>>, vector<2x1024xf32>
    %c0_1 = arith.constant 0 : index
    %c0_2 = arith.constant 0 : index
    %1 = vector.load %arg2[%c0_1, %c0_2] : memref<1024x32xf32, #tpu.memory_space<vmem>>, vector<1024x32xf32>
    %cst = arith.constant dense<0.000000e+00> : vector<2x32xf32>
    %2 = tpu.matmul %0, %1, %cst {dimension_numbers = #tpu.dot_dimension_numbers<[1], [0], [0], [1], [0, 0, 1, 1], [], []>} : vector<2x1024xf32>, vector<1024x32xf32>, vector<2x32xf32> -> vector<2x32xf32>
    %c0_3 = arith.constant 0 : index
    %c0_4 = arith.constant 0 : index
    %3 = vector.load %arg3[%c0_3, %c0_4] : memref<1x32xf32, #tpu.memory_space<vmem>>, vector<1x32xf32>
    %4 = vector.broadcast %3 : vector<1x32xf32> to vector<2x32xf32>
    %5 = arith.addf %2, %4 : vector<2x32xf32>
    %cst_5 = arith.constant 0.000000e+00 : f32
    %6 = vector.broadcast %cst_5 : f32 to vector<2x32xf32>
    %7 = arith.maximumf %5, %6 : vector<2x32xf32>
    %c0_6 = arith.constant 0 : index
    %c0_7 = arith.constant 0 : index
    %8 = vector.load %arg4[%c0_6, %c0_7] : memref<32x32xf32, #tpu.memory_space<vmem>>, vector<32x32xf32>
    %cst_8 = arith.constant dense<0.000000e+00> : vector<2x32xf32>
    %9 = tpu.matmul %7, %8, %cst_8 {dimension_numbers = #tpu.dot_dimension_numbers<[1], [0], [0], [1], [0, 0, 1, 1], [], []>} : vector<2x32xf32>, vector<32x32xf32>, vector<2x32xf32> -> vector<2x32xf32>
    %cst_9 = arith.constant 0.000000e+00 : f32
    %10 = vector.broadcast %cst_9 : f32 to vector<2x32xf32>
    %11 = arith.maximumf %9, %10 : vector<2x32xf32>
    %c0_10 = arith.constant 0 : index
    %c0_11 = arith.constant 0 : index
    %12 = vector.load %arg5[%c0_10, %c0_11] : memref<32x8xf32, #tpu.memory_space<vmem>>, vector<32x8xf32>
    %cst_12 = arith.constant dense<0.000000e+00> : vector<2x8xf32>
    %13 = tpu.matmul %11, %12, %cst_12 {dimension_numbers = #tpu.dot_dimension_numbers<[1], [0], [0], [1], [0, 0, 1, 1], [], []>} : vector<2x32xf32>, vector<32x8xf32>, vector<2x8xf32> -> vector<2x8xf32>
    %c0_13 = arith.constant 0 : index
    %c0_14 = arith.constant 0 : index
    %14 = vector.load %arg6[%c0_13, %c0_14] : memref<2x8xf32, #tpu.memory_space<vmem>>, vector<2x8xf32>
    tpu.vector_store %arg6[%c0_13, %c0_14], %13 {strides = array<i32>} : memref<2x8xf32, #tpu.memory_space<vmem>>, vector<2x8xf32>,
    return
  }
  func.func @transform_0(%arg0: i32) -> (i32, i32) {
    %c0_i32 = arith.constant 0 : i32
    %c0_i32_0 = arith.constant 0 : i32
    return %arg0, %c0_i32 : i32, i32
  }
  func.func @transform_1(%arg0: i32) -> (i32, i32) {
    %c0_i32 = arith.constant 0 : i32
    %c0_i32_0 = arith.constant 0 : i32
    %c0_i32_1 = arith.constant 0 : i32
    return %c0_i32, %c0_i32_0 : i32, i32
  }
  func.func @transform_2(%arg0: i32) -> (i32, i32) {
    %c0_i32 = arith.constant 0 : i32
    %c0_i32_0 = arith.constant 0 : i32
    %c0_i32_1 = arith.constant 0 : i32
    return %c0_i32, %c0_i32_0 : i32, i32
  }
  func.func @transform_3(%arg0: i32) -> (i32, i32) {
    %c0_i32 = arith.constant 0 : i32
    %c0_i32_0 = arith.constant 0 : i32
    %c0_i32_1 = arith.constant 0 : i32
    return %c0_i32, %c0_i32_0 : i32, i32
  }
  func.func @transform_4(%arg0: i32) -> (i32, i32) {
    %c0_i32 = arith.constant 0 : i32
    %c0_i32_0 = arith.constant 0 : i32
    %c0_i32_1 = arith.constant 0 : i32
    return %c0_i32, %c0_i32_0 : i32, i32
  }
  func.func @transform_5(%arg0: i32) -> (i32, i32) {
    %c0_i32 = arith.constant 0 : i32
    %c0_i32_0 = arith.constant 0 : i32
    return %arg0, %c0_i32 : i32, i32
  }
}

</mosaic_0001>

<bundles_post_ra>
// kernel: tpu_custom_call.1
= control target key start
LH: loop header
LB: loop body
LE: loop exit
PB: predicated region body
PF: predicated region fallthrough
CT: control target
= control target key end

     0   :  { %v1001_v47 = vmov 1983009808   ;;  %v164_v49 = vlaneseq  ;;  %s1476_s0 = inlined_call_operand.vmem [shape: f32[2,1024], index: 0, kind: input, shape index: {}]   ;;  %s1477_s1 = inlined_call_operand.vmem [shape: f32[1024,32], index: 1, kind: input, shape index: {}]   ;;  %s1478_s2 = inlined_call_operand.vmem [shape: f32[1,32], index: 2, kind: input, shape index: {}]   ;;  %s1479_s3 = inlined_call_operand.vmem [shape: f32[32,32], index: 3, kind: input, shape index: {}]   ;;  %s1480_s4 = inlined_call_operand.vmem [shape: f32[32,8], index: 4, kind: input, shape index: {}]   ;;  %s1481_s5 = inlined_call_operand.hbm [shape: f32[2,8], index: 5, kind: output, shape index: {}]  }
   0x1   :  { %v39_v0 = vld [vmem:[%s1477_s1 + $0x80] sm:$0xff]  ;;  %v40_v1 = vld [vmem:[%s1477_s1 + $0x88] sm:$0xff]  ;;  %v41_v11 = vld [vmem:[%s1477_s1 + $0x90] sm:$0xff]  ;;  %v162_v48 = vunpack.c.l.s4 %v1001_v47 }
   0x2   :  { %v23_v2 = vld [vmem:[%s1477_s1] sm:$0xff]  ;;  %v830_v3 = vpack.c.bf16 %v40_v1, %v39_v0  ;;  %v24_v4 = vld [vmem:[%s1477_s1 + $0x8] sm:$0xff]  ;;  %v42_v13 = vld [vmem:[%s1477_s1 + $0x98] sm:$0xff]  ;;  %v165_v0 = vshrl.u32 %v164_v49, 7 }
   0x3   :  { %v71_v5 = vld [vmem:[%s1477_s1 + $0x180] sm:$0xff]  ;;  %v72_v6 = vld [vmem:[%s1477_s1 + $0x188] sm:$0xff]  ;;  %v832_v7 = vpack.c.bf16 %v24_v4, %v23_v2  ;;  %v25_v14 = vld [vmem:[%s1477_s1 + $0x10] sm:$0xff]  ;;  %v834_v16 = vpack.c.bf16 %v42_v13, %v41_v11  ;;  %v163_v63 = vunpack.c.0.s8 %v162_v48 }
   0x4   :  { %v862_v8 = vpack.c.bf16 %v72_v6, %v71_v5  ;;  %v55_v9 = vld [vmem:[%s1477_s1 + $0x100] sm:$0xff]  ;;  %v56_v10 = vld [vmem:[%s1477_s1 + $0x108] sm:$0xff]  ;;  %831 = vmatprep.subr.bf16.mxu0 %v830_v3  ;;  %v26_v15 = vld [vmem:[%s1477_s1 + $0x18] sm:$0xff] }
   0x5   :  { %v864_v12 = vpack.c.bf16 %v56_v10, %v55_v9  ;;  %833 = vmatpush3.bf16.msra.mxu0 %v832_v7  ;;  %v836_v17 = vpack.c.bf16 %v26_v15, %v25_v14  ;;  %v73_v18 = vld [vmem:[%s1477_s1 + $0x190] sm:$0xff]  ;;  %v74_v19 = vld [vmem:[%s1477_s1 + $0x198] sm:$0xff]  ;;  %v43_v23 = vld [vmem:[%s1477_s1 + $0xa0] sm:$0xff]  ;;  %v1186_v13 = vsub.s32 %v163_v63, %v165_v0 }
   0x6   :  { %863 = vmatprep.subr.bf16.mxu1 %v862_v8  ;;  %v57_v20 = vld [vmem:[%s1477_s1 + $0x110] sm:$0xff]  ;;  %v866_v21 = vpack.c.bf16 %v74_v19, %v73_v18  ;;  %v58_v22 = vld [vmem:[%s1477_s1 + $0x118] sm:$0xff]  ;;  %v44_v24 = vld [vmem:[%s1477_s1 + $0xa8] sm:$0xff]  ;;  %835 = vmatprep.subr.bf16.mxu0 %v834_v16 }
   0x7   :  { %865 = vmatpush3.bf16.msra.mxu1 %v864_v12  ;;  %v868_v25 = vpack.c.bf16 %v58_v22, %v57_v20  ;;  %v838_v26 = vpack.c.bf16 %v44_v24, %v43_v23  ;;  %v27_v27 = vld [vmem:[%s1477_s1 + $0x20] sm:$0xff]  ;;  %v28_v28 = vld [vmem:[%s1477_s1 + $0x28] sm:$0xff]  ;;  %v45_v35 = vld [vmem:[%s1477_s1 + $0xb0] sm:$0xff] }
   0x8   :  { %v75_v29 = vld [vmem:[%s1477_s1 + $0x1a0] sm:$0xff]  ;;  %867 = vmatprep.subr.bf16.mxu1 %v866_v21  ;;  %v76_v30 = vld [vmem:[%s1477_s1 + $0x1a8] sm:$0xff]  ;;  %v840_v33 = vpack.c.bf16 %v28_v28, %v27_v27  ;;  %v46_v36 = vld [vmem:[%s1477_s1 + $0xb8] sm:$0xff] }
   0x9   :  { %v59_v31 = vld [vmem:[%s1477_s1 + $0x120] sm:$0xff]  ;;  %v60_v32 = vld [vmem:[%s1477_s1 + $0x128] sm:$0xff]  ;;  %837 = vmatpush3.bf16.msra.mxu0 %v836_v17  ;;  %v870_v34 = vpack.c.bf16 %v76_v30, %v75_v29  ;;  %v29_v37 = vld [vmem:[%s1477_s1 + $0x30] sm:$0xff]  ;;  %v842_v39 = vpack.c.bf16 %v46_v36, %v45_v35 }
   0xa   :  { %839 = vmatprep.subr.bf16.mxu0 %v838_v26  ;;  %v872_v38 = vpack.c.bf16 %v60_v32, %v59_v31  ;;  %v30_v40 = vld [vmem:[%s1477_s1 + $0x38] sm:$0xff]  ;;  %v77_v41 = vld [vmem:[%s1477_s1 + $0x1b0] sm:$0xff]  ;;  %v47_v46 = vld [vmem:[%s1477_s1 + $0xc0] sm:$0xff] }
   0xb   :  { %869 = vmatpush3.bf16.msra.mxu1 %v868_v25  ;;  %v78_v42 = vld [vmem:[%s1477_s1 + $0x1b8] sm:$0xff]  ;;  %v61_v44 = vld [vmem:[%s1477_s1 + $0x130] sm:$0xff]  ;;  %v48_v50 = vld [vmem:[%s1477_s1 + $0xc8] sm:$0xff]  ;;  %v844_v51 = vpack.c.bf16 %v30_v40, %v29_v37 }
   0xc   :  { %871 = vmatprep.subr.bf16.mxu1 %v870_v34  ;;  %v874_v43 = vpack.c.bf16 %v78_v42, %v77_v41  ;;  %v62_v45 = vld [vmem:[%s1477_s1 + $0x138] sm:$0xff]  ;;  %v79_v52 = vld [vmem:[%s1477_s1 + $0x1c0] sm:$0xff]  ;;  %v80_v53 = vld [vmem:[%s1477_s1 + $0x1c8] sm:$0xff]  ;;  %v846_v55 = vpack.c.bf16 %v48_v50, %v47_v46 }
   0xd   :  { %841 = vmatpush3.bf16.msra.mxu0 %v840_v33  ;;  %v876_v54 = vpack.c.bf16 %v62_v45, %v61_v44  ;;  %v31_v56 = vld [vmem:[%s1477_s1 + $0x40] sm:$0xff]  ;;  %v32_v57 = vld [vmem:[%s1477_s1 + $0x48] sm:$0xff]  ;;  %v878_v59 = vpack.c.bf16 %v80_v53, %v79_v52  ;;  %v49_v61 = vld [vmem:[%s1477_s1 + $0xd0] sm:$0xff] }
   0xe   :  { %843 = vmatprep.subr.bf16.mxu0 %v842_v39  ;;  %v63_v58 = vld [vmem:[%s1477_s1 + $0x140] sm:$0xff]  ;;  %v64_v60 = vld [vmem:[%s1477_s1 + $0x148] sm:$0xff]  ;;  %v50_v62 = vld [vmem:[%s1477_s1 + $0xd8] sm:$0xff]  ;;  %v848_v3 = vpack.c.bf16 %v32_v57, %v31_v56 }
   0xf   :  { %873 = vmatpush3.bf16.msra.mxu1 %v872_v38  ;;  %v81_v1 = vld [vmem:[%s1477_s1 + $0x1d0] sm:$0xff]  ;;  %v82_v2 = vld [vmem:[%s1477_s1 + $0x1d8] sm:$0xff]  ;;  %v880_v4 = vpack.c.bf16 %v64_v60, %v63_v58  ;;  %v850_v5 = vpack.c.bf16 %v50_v62, %v49_v61  ;;  %v51_v11 = vld [vmem:[%s1477_s1 + $0xe0] sm:$0xff] }
  0x10   :  { %875 = vmatprep.subr.bf16.mxu1 %v874_v43  ;;  %v33_v6 = vld [vmem:[%s1477_s1 + $0x50] sm:$0xff]  ;;  %v34_v7 = vld [vmem:[%s1477_s1 + $0x58] sm:$0xff]  ;;  %v882_v9 = vpack.c.bf16 %v82_v2, %v81_v1  ;;  %v52_v12 = vld [vmem:[%s1477_s1 + $0xe8] sm:$0xff] }
  0x11   :  { %845 = vmatpush3.bf16.msra.mxu0 %v844_v51  ;;  %v65_v8 = vld [vmem:[%s1477_s1 + $0x150] sm:$0xff]  ;;  %v66_v10 = vld [vmem:[%s1477_s1 + $0x158] sm:$0xff]  ;;  %v83_v14 = vld [vmem:[%s1477_s1 + $0x1e0] sm:$0xff]  ;;  %v852_v16 = vpack.c.bf16 %v34_v7, %v33_v6  ;;  %v854_v19 = vpack.c.bf16 %v52_v12, %v51_v11 }
  0x12   :  { %847 = vmatprep.subr.bf16.mxu0 %v846_v55  ;;  %v84_v15 = vld [vmem:[%s1477_s1 + $0x1e8] sm:$0xff]  ;;  %v35_v17 = vld [vmem:[%s1477_s1 + $0x60] sm:$0xff]  ;;  %v884_v18 = vpack.c.bf16 %v66_v10, %v65_v8  ;;  %v53_v25 = vld [vmem:[%s1477_s1 + $0xf0] sm:$0xff] }
  0x13   :  { %877 = vmatpush3.bf16.msra.mxu1 %v876_v54  ;;  %v36_v20 = vld [vmem:[%s1477_s1 + $0x68] sm:$0xff]  ;;  %v67_v21 = vld [vmem:[%s1477_s1 + $0x160] sm:$0xff]  ;;  %v886_v23 = vpack.c.bf16 %v84_v15, %v83_v14  ;;  %v54_v26 = vld [vmem:[%s1477_s1 + $0xf8] sm:$0xff] }
  0x14   :  { %879 = vmatprep.subr.bf16.mxu1 %v878_v59  ;;  %v21_v22 = vld [vmem:[%s1476_s0] sm:$0xff]  ;;  %v68_v24 = vld [vmem:[%s1477_s1 + $0x168] sm:$0xff]  ;;  %v85_v29 = vld [vmem:[%s1477_s1 + $0x1f0] sm:$0xff]  ;;  %v856_v31 = vpack.c.bf16 %v36_v20, %v35_v17  ;;  %v858_v35 = vpack.c.bf16 %v54_v26, %v53_v25 }
  0x15   :  { %849 = vmatpush3.bf16.msra.mxu0 %v848_v3  ;;  %v167_v27 = vrot.slane %v21_v22, %v1186_v13  ;;  %v160_v28 = vcombine.high %v21_v22, %v21_v22  ;;  %v86_v30 = vld [vmem:[%s1477_s1 + $0x1f8] sm:$0xff]  ;;  %v888_v34 = vpack.c.bf16 %v68_v24, %v67_v21  ;;  %v37_v36 = vld [vmem:[%s1477_s1 + $0x70] sm:$0xff]  ;;  %v103_v41 = vld [vmem:[%s1477_s1 + $0x280] sm:$0xff] }
  0x16   :  { %851 = vmatprep.subr.bf16.mxu0 %v850_v5  ;;  %v38_v37 = vld [vmem:[%s1477_s1 + $0x78] sm:$0xff]  ;;  %v69_v38 = vld [vmem:[%s1477_s1 + $0x170] sm:$0xff]  ;;  %v890_v39 = vpack.c.bf16 %v86_v30, %v85_v29  ;;  %v104_v42 = vld [vmem:[%s1477_s1 + $0x288] sm:$0xff] }
  0x17   :  { %881 = vmatpush3.bf16.msra.mxu1 %v880_v4  ;;  %v175_v32 = vcombine.high %v167_v27, %v167_v27  ;;  %v174_v33 = vrot.slane %v160_v28, %v1186_v13  ;;  %v70_v40 = vld [vmem:[%s1477_s1 + $0x178] sm:$0xff]  ;;  %v135_v44 = vld [vmem:[%s1477_s1 + $0x380] sm:$0xff]  ;;  %v136_v45 = vld [vmem:[%s1477_s1 + $0x388] sm:$0xff]  ;;  %v860_v46 = vpack.c.bf16 %v38_v37, %v37_v36  ;;  %v894_v48 = vpack.c.bf16 %v104_v42, %v103_v41 }
  0x18   :  { %883 = vmatprep.subr.bf16.mxu1 %v882_v9  ;;  %v892_v47 = vpack.c.bf16 %v70_v40, %v69_v38  ;;  %v87_v49 = vld [vmem:[%s1477_s1 + $0x200] sm:$0xff]  ;;  %v88_v50 = vld [vmem:[%s1477_s1 + $0x208] sm:$0xff]  ;;  %v926_v52 = vpack.c.bf16 %v136_v45, %v135_v44  ;;  %v105_v54 = vld [vmem:[%s1477_s1 + $0x290] sm:$0xff] }
  0x19   :  { %853 = vmatpush3.bf16.msra.mxu0 %v852_v16  ;;  %266 = vmatprep.mubr.f32.mxu0 %v175_v32  ;;  %v176_v43 = vcombine.high %v174_v33, %v174_v33  ;;  %v119_v51 = vld [vmem:[%s1477_s1 + $0x300] sm:$0xff]  ;;  %v120_v53 = vld [vmem:[%s1477_s1 + $0x308] sm:$0xff]  ;;  %v106_v55 = vld [vmem:[%s1477_s1 + $0x298] sm:$0xff]  ;;  %v896_v58 = vpack.c.bf16 %v88_v50, %v87_v49 }
  0x1a   :  { %855 = vmatprep.subr.bf16.mxu0 %v854_v19  ;;  %v137_v56 = vld [vmem:[%s1477_s1 + $0x390] sm:$0xff]  ;;  %v138_v57 = vld [vmem:[%s1477_s1 + $0x398] sm:$0xff]  ;;  %v928_v59 = vpack.c.bf16 %v120_v53, %v119_v51  ;;  %v898_v60 = vpack.c.bf16 %v106_v55, %v105_v54  ;;  %v107_v2 = vld [vmem:[%s1477_s1 + $0x2a0] sm:$0xff] }
  0x1b   :  { %885 = vmatpush3.bf16.msra.mxu1 %v884_v18  ;;  %336 = vmatprep.mubr.f32.mxu1 %v176_v43  ;;  %v89_v61 = vld [vmem:[%s1477_s1 + $0x210] sm:$0xff]  ;;  %v90_v62 = vld [vmem:[%s1477_s1 + $0x218] sm:$0xff]  ;;  %v930_v0 = vpack.c.bf16 %v138_v57, %v137_v56  ;;  %v108_v3 = vld [vmem:[%s1477_s1 + $0x2a8] sm:$0xff] }
  0x1c   :  { %887 = vmatprep.subr.bf16.mxu1 %v886_v23  ;;  %v121_v63 = vld [vmem:[%s1477_s1 + $0x310] sm:$0xff]  ;;  %v122_v1 = vld [vmem:[%s1477_s1 + $0x318] sm:$0xff]  ;;  %v139_v4 = vld [vmem:[%s1477_s1 + $0x3a0] sm:$0xff]  ;;  %v900_v6 = vpack.c.bf16 %v90_v62, %v89_v61  ;;  %v902_v8 = vpack.c.bf16 %v108_v3, %v107_v2 }
  0x1d   :  { %857 = vmatpush3.bf16.msra.mxu0 %v856_v31  ;;  %v140_v5 = vld [vmem:[%s1477_s1 + $0x3a8] sm:$0xff]  ;;  %v932_v7 = vpack.c.bf16 %v122_v1, %v121_v63  ;;  %v91_v9 = vld [vmem:[%s1477_s1 + $0x220] sm:$0xff]  ;;  %v109_v15 = vld [vmem:[%s1477_s1 + $0x2b0] sm:$0xff] }
  0x1e   :  { %859 = vmatprep.subr.bf16.mxu0 %v858_v35  ;;  %v92_v10 = vld [vmem:[%s1477_s1 + $0x228] sm:$0xff]  ;;  %v123_v11 = vld [vmem:[%s1477_s1 + $0x320] sm:$0xff]  ;;  %v934_v12 = vpack.c.bf16 %v140_v5, %v139_v4  ;;  %v110_v16 = vld [vmem:[%s1477_s1 + $0x2b8] sm:$0xff] }
  0x1f   :  { %889 = vmatpush3.bf16.msra.mxu1 %v888_v34  ;;  %v124_v14 = vld [vmem:[%s1477_s1 + $0x328] sm:$0xff]  ;;  %v141_v17 = vld [vmem:[%s1477_s1 + $0x3b0] sm:$0xff]  ;;  %v142_v18 = vld [vmem:[%s1477_s1 + $0x3b8] sm:$0xff]  ;;  %v904_v19 = vpack.c.bf16 %v92_v10, %v91_v9  ;;  %v906_v22 = vpack.c.bf16 %v110_v16, %v109_v15 }
  0x20   :  { %891 = vmatprep.subr.bf16.mxu1 %v890_v39  ;;  %v93_v20 = vld [vmem:[%s1477_s1 + $0x230] sm:$0xff]  ;;  %v936_v21 = vpack.c.bf16 %v124_v14, %v123_v11  ;;  %v94_v23 = vld [vmem:[%s1477_s1 + $0x238] sm:$0xff]  ;;  %v938_v26 = vpack.c.bf16 %v142_v18, %v141_v17  ;;  %v112_v28 = vld [vmem:[%s1477_s1 + $0x2c8] sm:$0xff] }
  0x21   :  { %861 = vmatpush3.bf16.msra.mxu0 %v860_v46  ;;  %v125_v24 = vld [vmem:[%s1477_s1 + $0x330] sm:$0xff]  ;;  %v126_v25 = vld [vmem:[%s1477_s1 + $0x338] sm:$0xff]  ;;  %v143_v29 = vld [vmem:[%s1477_s1 + $0x3c0] sm:$0xff] }
  0x22   :  { %895 = vmatprep.subr.bf16.mxu0 %v894_v48  ;;  %v144_v30 = vld [vmem:[%s1477_s1 + $0x3c8] sm:$0xff] }
  0x23   :  { %893 = vmatpush3.bf16.msra.mxu1 %v892_v47  ;;  %v22_v31 = vld [vmem:[%s1476_s0 + $0x8] sm:$0xff] }
  0x24   :  { %927 = vmatprep.subr.bf16.mxu1 %v926_v52  ;;  %267 = vmatmul.mubr.f32.vlgmr.msra.gmra.mrb[0].mxu0 %v167_v27  ;;  %v111_v27 = vld [vmem:[%s1477_s1 + $0x2c0] sm:$0xff] }
  0x25   :  { %897 = vmatpush3.bf16.msra.mxu0 %v896_v58 }
  0x26   :  { %337 = vmatmul.mubr.f32.vlgmr.msra.gmra.mrb[0].mxu1 %v174_v33  ;;  %899 = vmatprep.subr.bf16.mxu0 %v898_v60 }
  0x27   :  { %929 = vmatpush3.bf16.msra.mxu1 %v928_v59 }
  0x28   :  { %931 = vmatprep.subr.bf16.mxu1 %v930_v0 }
  0x29   :  { %901 = vmatpush3.bf16.msra.mxu0 %v900_v6 }
  0x2a   :  { %903 = vmatprep.subr.bf16.mxu0 %v902_v8 }
  0x2b   :  { %933 = vmatpush3.bf16.msra.mxu1 %v932_v7 }
  0x2c   :  { %935 = vmatprep.subr.bf16.mxu1 %v934_v12 }
  0x2d   :  { %10 = vsyncpa [#allocation3], 0  ;;  %905 = vmatpush3.bf16.msra.mxu0 %v904_v19  ;;  %v908_v32 = vpack.c.bf16 %v94_v23, %v93_v20  ;;  %v1347_v33 = vrot.slane %v22_v31, %v1186_v13  ;;  %v177_v34 = vcombine.high %v22_v31, %v22_v31  ;;  %v940_v35 = vpack.c.bf16 %v126_v25, %v125_v24  ;;  %v95_v37 = vld [vmem:[%s1477_s1 + $0x240] sm:$0xff]  ;;  %v96_v38 = vld [vmem:[%s1477_s1 + $0x248] sm:$0xff]  ;;  %s1005_s15 = smov [#allocation2]  }
  0x2e   :  { %907 = vmatprep.subr.bf16.mxu0 %v906_v22  ;;  %v910_v36 = vpack.c.bf16 %v112_v28, %v111_v27  ;;  %v127_v39 = vld [vmem:[%s1477_s1 + $0x340] sm:$0xff]  ;;  %v942_v40 = vpack.c.bf16 %v144_v30, %v143_v29  ;;  %v128_v41 = vld [vmem:[%s1477_s1 + $0x348] sm:$0xff]  ;;  %v113_v42 = vld [vmem:[%s1477_s1 + $0x2d0] sm:$0xff]  ;;  %v912_v48 = vpack.c.bf16 %v96_v38, %v95_v37  ;;  %v1002_v22 = vmov 0.0|0.0   ;;  %s647_s16 = sshll.u32 %s1005_s15, 4  ;;  %s648_s16 = int_to_ptr.vmem [resolvable:$true] %s647_s16 }
  0x2f   :  { %937 = vmatpush3.bf16.msra.mxu1 %v936_v21  ;;  %v114_v43 = vld [vmem:[%s1477_s1 + $0x2d8] sm:$0xff]  ;;  %v192_v44 = vcombine.high %v1347_v33, %v1347_v33  ;;  %v191_v45 = vrot.slane %v177_v34, %v1186_v13  ;;  %v145_v46 = vld [vmem:[%s1477_s1 + $0x3d0] sm:$0xff]  ;;  %v944_v50 = vpack.c.bf16 %v128_v41, %v127_v39  ;;  %v115_v56 = vld [vmem:[%s1477_s1 + $0x2e0] sm:$0xff]  ;;  %vm1003_vm0 = vmmov 0   ;;  %s977_s17 = scalar_lea.vmem %s648_s16, 32  ;;  %p982_p1 = scmp.lt.s32.totalorder %s648_s16, %s648_s16 }
  0x30   :  { %939 = vmatprep.subr.bf16.mxu1 %v938_v26  ;;  %v146_v47 = vld [vmem:[%s1477_s1 + $0x3d8] sm:$0xff]  ;;  %v914_v51 = vpack.c.bf16 %v114_v43, %v113_v42  ;;  %v97_v13 = vld [vmem:[%s1477_s1 + $0x250] sm:$0xff]  ;;  %v116_v57 = vld [vmem:[%s1477_s1 + $0x2e8] sm:$0xff]  ;;  %v1004_v26 = vmov 0.0   ;;  %vm487_vm1 = vcmask 261120   ;;  %vm639_vm2 = vcmask 58368   ;;  %p978_p0 = scmp.ne.s32.totalorder %s648_s16, %s977_s17  ;;  %p983_p2 = scmp.lt.s32.totalorder %s977_s17, %s977_s17 }
  0x31   :  { %909 = vmatpush3.bf16.msra.mxu0 %v908_v32  ;;  %406 = vmatprep.mubr.f32.mxu0 %v192_v44  ;;  %v193_v49 = vcombine.high %v191_v45, %v191_v45  ;;  %v98_v52 = vld [vmem:[%s1477_s1 + $0x258] sm:$0xff]  ;;  %v129_v53 = vld [vmem:[%s1477_s1 + $0x350] sm:$0xff]  ;;  %v946_v54 = vpack.c.bf16 %v146_v47, %v145_v46  ;;  %v147_v58 = vld [vmem:[%s1477_s1 + $0x3e0] sm:$0xff]  ;;  %v918_v62 = vpack.c.bf16 %v116_v57, %v115_v56 }
  0x32   :  { %911 = vmatprep.subr.bf16.mxu0 %v910_v36  ;;  %v130_v55 = vld [vmem:[%s1477_s1 + $0x358] sm:$0xff]  ;;  %v148_v59 = vld [vmem:[%s1477_s1 + $0x3e8] sm:$0xff]  ;;  %v916_v60 = vpack.c.bf16 %v98_v52, %v97_v13  ;;  %v99_v63 = vld [vmem:[%s1477_s1 + $0x260] sm:$0xff]  ;;  %p984_p3 = por %p983_p2, %p982_p1 }
  0x33   :  { %941 = vmatpush3.bf16.msra.mxu1 %v940_v35  ;;  %476 = vmatprep.mubr.f32.mxu1 %v193_v49  ;;  %v948_v61 = vpack.c.bf16 %v130_v55, %v129_v53  ;;  %v100_v0 = vld [vmem:[%s1477_s1 + $0x268] sm:$0xff]  ;;  %v131_v1 = vld [vmem:[%s1477_s1 + $0x360] sm:$0xff]  ;;  %v950_v2 = vpack.c.bf16 %v148_v59, %v147_v58  ;;  %v117_v4 = vld [vmem:[%s1477_s1 + $0x2f0] sm:$0xff] }
  0x34   :  { %943 = vmatprep.subr.bf16.mxu1 %v942_v40  ;;  %v132_v3 = vld [vmem:[%s1477_s1 + $0x368] sm:$0xff]  ;;  %v118_v5 = vld [vmem:[%s1477_s1 + $0x2f8] sm:$0xff]  ;;  %v149_v6 = vld [vmem:[%s1477_s1 + $0x3f0] sm:$0xff]  ;;  %v920_v8 = vpack.c.bf16 %v100_v0, %v99_v63  ;;  %p985_p4 = pnand %p984_p3, %p978_p0 }
  0x35   :  { %913 = vmatpush3.bf16.msra.mxu0 %v912_v48  ;;  %v150_v7 = vld [vmem:[%s1477_s1 + $0x3f8] sm:$0xff]  ;;  %v952_v9 = vpack.c.bf16 %v132_v3, %v131_v1  ;;  %v922_v10 = vpack.c.bf16 %v118_v5, %v117_v4  ;;  %v101_v11 = vld [vmem:[%s1477_s1 + $0x270] sm:$0xff]  ;;  %v483_v19 = vld [vmem:[%s1479_s3] sm:$0xff] }
  0x36   :  { %915 = vmatprep.subr.bf16.mxu0 %v914_v51  ;;  %v102_v12 = vld [vmem:[%s1477_s1 + $0x278] sm:$0xff]  ;;  %v954_v14 = vpack.c.bf16 %v150_v7, %v149_v6  ;;  %v133_v15 = vld [vmem:[%s1477_s1 + $0x370] sm:$0xff]  ;;  %v484_v20 = vld [vmem:[%s1479_s3 + $0x8] sm:$0xff] }
  0x37   :  { %945 = vmatpush3.bf16.msra.mxu1 %v944_v50  ;;  %v134_v16 = vld [vmem:[%s1477_s1 + $0x378] sm:$0xff]  ;;  %v924_v17 = vpack.c.bf16 %v102_v12, %v101_v11  ;;  %v959_v21 = vpack.c.bf16 %v484_v20, %v483_v19  ;;  %v485_v23 = vld [vmem:[%s1479_s3 + $0x10] sm:$0xff]  ;;  %v562_v27 = vld [vmem:[%s1480_s4] sm:$0xff] }
  0x38   :  { %947 = vmatprep.subr.bf16.mxu1 %v946_v54  ;;  %v956_v18 = vpack.c.bf16 %v134_v16, %v133_v15  ;;  %v486_v24 = vld [vmem:[%s1479_s3 + $0x18] sm:$0xff]  ;;  %v563_v28 = vld [vmem:[%s1480_s4 + $0x8] sm:$0xff]  ;;  %v655_v31 = vld [vmem:[%s1478_s2] ss:$0 sm:$0xff] }
  0x39   :  { %917 = vmatpush3.bf16.msra.mxu0 %v916_v60  ;;  %v962_v25 = vpack.c.bf16 %v486_v24, %v485_v23  ;;  %v965_v29 = vpack.c.bf16 %v563_v28, %v562_v27  ;;  %v564_v48 = vld [vmem:[%s1480_s4 + $0x10] sm:$0xff]  ;;  %v565_v49 = vld [vmem:[%s1480_s4 + $0x18] sm:$0xff] }
  0x3a   :  { %919 = vmatprep.subr.bf16.mxu0 %v918_v62  ;;  %v968_v50 = vpack.c.bf16 %v565_v49, %v564_v48 }
  0x3b   :  { %949 = vmatpush3.bf16.msra.mxu1 %v948_v61 }
  0x3c   :  { %951 = vmatprep.subr.bf16.mxu1 %v950_v2 }
  0x3d   :  { %921 = vmatpush3.bf16.msra.mxu0 %v920_v8 }
  0x3e   :  { %923 = vmatprep.subr.bf16.mxu0 %v922_v10 }
  0x3f   :  { %953 = vmatpush3.bf16.msra.mxu1 %v952_v9 }
  0x40   :  { %955 = vmatprep.subr.bf16.mxu1 %v954_v14 }
  0x41   :  { %925 = vmatpush3.bf16.msra.mxu0 %v924_v17 }
  0x42   :  { %958 = vmatprep.subr.bf16.mxu0 %v1002_v22 }
  0x43   :  { %957 = vmatpush3.bf16.msra.mxu1 %v956_v18 }
  0x44   :  { %407 = vmatmul.mubr.f32.vlgmr.msra.gmra.mrb[2].mxu0 %v1347_v33  ;;  %964 = vmatprep.subr.bf16.mxu1 %v1002_v22 }
  0x45   :  { %960 = vmatpush3.bf16.msra.mxu0 %v959_v21  ;;  %816 = vmatprep.mubr.msk.f32.mxu0 %vm1003_vm0, %v1004_v26 }
  0x46   :  { %477 = vmatmul.mubr.f32.vlgmr.msra.gmra.mrb[2].mxu1 %v191_v45  ;;  %961 = vmatprep.subr.bf16.mxu0 %v1002_v22 }
  0x47   :  { %827 = vmatprep.mubr.msk.f32.mxu1 %vm1003_vm0, %v1004_v26  ;;  %966 = vmatpush3.bf16.msra.mxu1 %v965_v29 }
  0x48   :  { %967 = vmatprep.subr.bf16.mxu1 %v1002_v22 }
  0x49   :  { %963 = vmatpush3.bf16.msra.mxu0 %v962_v25 }
  0x4b   :  { %969 = vmatpush3.bf16.msra.mxu1 %v968_v50 }
  0xf7   :  { %v690_v30 = vpop.f32.mrb[0].mxu0 }
  0xf8   :  { %v691_v32 = vpop.f32.mrb[1].mxu0 }
  0xf9   :  { %v725_v33 = vpop.f32.mrb[0].mxu1  ;;  %v692_v34 = vadd.f32 %v691_v32, %v690_v30 }
  0xfa   :  { %v726_v35 = vpop.f32.mrb[1].mxu1 }
  0xfb   :  { %v727_v36 = vadd.f32 %v726_v35, %v725_v33  ;;  %v269_v37 = vadd.f32 %v692_v34, %v655_v31 }
  0xfd   :  { %v339_v38 = vadd.f32 %v727_v36, %v269_v37 }
 0x117   :  { %v760_v39 = vpop.f32.mrb[2].mxu0 }
 0x118   :  { %v761_v40 = vpop.f32.mrb[3].mxu0 }
 0x119   :  { %v795_v41 = vpop.f32.mrb[2].mxu1  ;;  %v762_v42 = vadd.f32 %v761_v40, %v760_v39 }
 0x11a   :  { %v796_v43 = vpop.f32.mrb[3].mxu1 }
 0x11b   :  { %v797_v44 = vadd.f32 %v796_v43, %v795_v41  ;;  %v409_v45 = vadd.f32 %v762_v42, %v339_v38 }
 0x11d   :  { %v479_v46 = vadd.f32 %v797_v44, %v409_v45 }
 0x11f   :  { %v482_v47 = vmax.f32 %v479_v46, 0.0 }
 0x121   :  { %817 = vmatmul.mubr.msk.f32.vlgmr.msra.gmra.mrb[4].mxu0 %vm487_vm1, %v482_v47 }
 0x1f4   :  { %v557_v51 = vpop.f32.mrb[4].mxu0 }
 0x1f5   :  { %v561_v13 = vmax.f32 %v557_v51, 0.0  ;;  %v818_v52 = vpop.f32.mrb[5].mxu0 }
 0x1f7   :  { %828 = vmatmul.mubr.msk.f32.vlgmr.msra.gmra.mrb[4].mxu1 %vm487_vm1, %v561_v13 }
 0x2ca   :  { %v635_v53 = vpop.f32.mrb[4].mxu1 }
 0x2cb   :  { %640 = vst.msk [vmem:[#allocation2] sm:$0x3] %vm639_vm2, %v635_v53  ;;  %v829_v54 = vpop.f32.mrb[5].mxu1 }
 0x2cc   :  { %988 = shalt.err (!%p985_p4)
}
 0x2cd   :  { %s989_s19 = scalar_lea.hbm %s1481_s5, 32 }
 0x2ce   :  { %p990_p5 = scmp.ne.s32.totalorder %s1481_s5, %s989_s19  ;;  %p993_p6 = scmp.lt.u32.totalorder %s989_s19, %s1481_s5 }
 0x2d0   :  { %p995_p7 = pnand %p993_p6, %p990_p5 }
 0x2d2   :  { %998 = shalt.err (!%p995_p7)
}
 0x2d3   :  { %650 = dma.vmem_to_hbm [thread:$0]  %s648_s16, 32, %s1481_s5, [#allocation3]  }
 0x2d4   :  { %999 = dma.done.wait [#allocation3], 32  }
 0x2d5   :  { %1000 = vsyncadd [#allocation3], 4294967264 }
 0x2d6   :  { %654 = vsyncpa [#allocation3], 1 }

// kernel: tpu_custom_call.1
= control target key start
LH: loop header
LB: loop body
LE: loop exit
PB: predicated region body
PF: predicated region fallthrough
CT: control target
= control target key end

     0   :  { %v1001_v47 = vmov 1983009808   ;;  %v164_v49 = vlaneseq  ;;  %s1476_s0 = inlined_call_operand.vmem [shape: f32[2,1024], index: 0, kind: input, shape index: {}]   ;;  %s1477_s1 = inlined_call_operand.vmem [shape: f32[1024,32], index: 1, kind: input, shape index: {}]   ;;  %s1478_s2 = inlined_call_operand.vmem [shape: f32[1,32], index: 2, kind: input, shape index: {}]   ;;  %s1479_s3 = inlined_call_operand.vmem [shape: f32[32,32], index: 3, kind: input, shape index: {}]   ;;  %s1480_s4 = inlined_call_operand.vmem [shape: f32[32,8], index: 4, kind: input, shape index: {}]   ;;  %s1481_s5 = inlined_call_operand.hbm [shape: f32[2,8], index: 5, kind: output, shape index: {}]  }
   0x1   :  { %v39_v0 = vld [vmem:[%s1477_s1 + $0x80] sm:$0xff]  ;;  %v40_v1 = vld [vmem:[%s1477_s1 + $0x88] sm:$0xff]  ;;  %v41_v11 = vld [vmem:[%s1477_s1 + $0x90] sm:$0xff]  ;;  %v162_v48 = vunpack.c.l.s4 %v1001_v47 }
   0x2   :  { %v23_v2 = vld [vmem:[%s1477_s1] sm:$0xff]  ;;  %v830_v3 = vpack.c.bf16 %v40_v1, %v39_v0  ;;  %v24_v4 = vld [vmem:[%s1477_s1 + $0x8] sm:$0xff]  ;;  %v42_v13 = vld [vmem:[%s1477_s1 + $0x98] sm:$0xff]  ;;  %v165_v0 = vshrl.u32 %v164_v49, 7 }
   0x3   :  { %v71_v5 = vld [vmem:[%s1477_s1 + $0x180] sm:$0xff]  ;;  %v72_v6 = vld [vmem:[%s1477_s1 + $0x188] sm:$0xff]  ;;  %v832_v7 = vpack.c.bf16 %v24_v4, %v23_v2  ;;  %v25_v14 = vld [vmem:[%s1477_s1 + $0x10] sm:$0xff]  ;;  %v834_v16 = vpack.c.bf16 %v42_v13, %v41_v11  ;;  %v163_v63 = vunpack.c.0.s8 %v162_v48 }
   0x4   :  { %v862_v8 = vpack.c.bf16 %v72_v6, %v71_v5  ;;  %v55_v9 = vld [vmem:[%s1477_s1 + $0x100] sm:$0xff]  ;;  %v56_v10 = vld [vmem:[%s1477_s1 + $0x108] sm:$0xff]  ;;  %831 = vmatprep.subr.bf16.mxu0 %v830_v3  ;;  %v26_v15 = vld [vmem:[%s1477_s1 + $0x18] sm:$0xff] }
   0x5   :  { %v864_v12 = vpack.c.bf16 %v56_v10, %v55_v9  ;;  %833 = vmatpush3.bf16.msra.mxu0 %v832_v7  ;;  %v836_v17 = vpack.c.bf16 %v26_v15, %v25_v14  ;;  %v73_v18 = vld [vmem:[%s1477_s1 + $0x190] sm:$0xff]  ;;  %v74_v19 = vld [vmem:[%s1477_s1 + $0x198] sm:$0xff]  ;;  %v43_v23 = vld [vmem:[%s1477_s1 + $0xa0] sm:$0xff]  ;;  %v1186_v13 = vsub.s32 %v163_v63, %v165_v0 }
   0x6   :  { %863 = vmatprep.subr.bf16.mxu1 %v862_v8  ;;  %v57_v20 = vld [vmem:[%s1477_s1 + $0x110] sm:$0xff]  ;;  %v866_v21 = vpack.c.bf16 %v74_v19, %v73_v18  ;;  %v58_v22 = vld [vmem:[%s1477_s1 + $0x118] sm:$0xff]  ;;  %v44_v24 = vld [vmem:[%s1477_s1 + $0xa8] sm:$0xff]  ;;  %835 = vmatprep.subr.bf16.mxu0 %v834_v16 }
   0x7   :  { %865 = vmatpush3.bf16.msra.mxu1 %v864_v12  ;;  %v868_v25 = vpack.c.bf16 %v58_v22, %v57_v20  ;;  %v838_v26 = vpack.c.bf16 %v44_v24, %v43_v23  ;;  %v27_v27 = vld [vmem:[%s1477_s1 + $0x20] sm:$0xff]  ;;  %v28_v28 = vld [vmem:[%s1477_s1 + $0x28] sm:$0xff]  ;;  %v45_v35 = vld [vmem:[%s1477_s1 + $0xb0] sm:$0xff] }
   0x8   :  { %v75_v29 = vld [vmem:[%s1477_s1 + $0x1a0] sm:$0xff]  ;;  %867 = vmatprep.subr.bf16.mxu1 %v866_v21  ;;  %v76_v30 = vld [vmem:[%s1477_s1 + $0x1a8] sm:$0xff]  ;;  %v840_v33 = vpack.c.bf16 %v28_v28, %v27_v27  ;;  %v46_v36 = vld [vmem:[%s1477_s1 + $0xb8] sm:$0xff] }
   0x9   :  { %v59_v31 = vld [vmem:[%s1477_s1 + $0x120] sm:$0xff]  ;;  %v60_v32 = vld [vmem:[%s1477_s1 + $0x128] sm:$0xff]  ;;  %837 = vmatpush3.bf16.msra.mxu0 %v836_v17  ;;  %v870_v34 = vpack.c.bf16 %v76_v30, %v75_v29  ;;  %v29_v37 = vld [vmem:[%s1477_s1 + $0x30] sm:$0xff]  ;;  %v842_v39 = vpack.c.bf16 %v46_v36, %v45_v35 }
   0xa   :  { %839 = vmatprep.subr.bf16.mxu0 %v838_v26  ;;  %v872_v38 = vpack.c.bf16 %v60_v32, %v59_v31  ;;  %v30_v40 = vld [vmem:[%s1477_s1 + $0x38] sm:$0xff]  ;;  %v77_v41 = vld [vmem:[%s1477_s1 + $0x1b0] sm:$0xff]  ;;  %v47_v46 = vld [vmem:[%s1477_s1 + $0xc0] sm:$0xff] }
   0xb   :  { %869 = vmatpush3.bf16.msra.mxu1 %v868_v25  ;;  %v78_v42 = vld [vmem:[%s1477_s1 + $0x1b8] sm:$0xff]  ;;  %v61_v44 = vld [vmem:[%s1477_s1 + $0x130] sm:$0xff]  ;;  %v48_v50 = vld [vmem:[%s1477_s1 + $0xc8] sm:$0xff]  ;;  %v844_v51 = vpack.c.bf16 %v30_v40, %v29_v37 }
   0xc   :  { %871 = vmatprep.subr.bf16.mxu1 %v870_v34  ;;  %v874_v43 = vpack.c.bf16 %v78_v42, %v77_v41  ;;  %v62_v45 = vld [vmem:[%s1477_s1 + $0x138] sm:$0xff]  ;;  %v79_v52 = vld [vmem:[%s1477_s1 + $0x1c0] sm:$0xff]  ;;  %v80_v53 = vld [vmem:[%s1477_s1 + $0x1c8] sm:$0xff]  ;;  %v846_v55 = vpack.c.bf16 %v48_v50, %v47_v46 }
   0xd   :  { %841 = vmatpush3.bf16.msra.mxu0 %v840_v33  ;;  %v876_v54 = vpack.c.bf16 %v62_v45, %v61_v44  ;;  %v31_v56 = vld [vmem:[%s1477_s1 + $0x40] sm:$0xff]  ;;  %v32_v57 = vld [vmem:[%s1477_s1 + $0x48] sm:$0xff]  ;;  %v878_v59 = vpack.c.bf16 %v80_v53, %v79_v52  ;;  %v49_v61 = vld [vmem:[%s1477_s1 + $0xd0] sm:$0xff] }
   0xe   :  { %843 = vmatprep.subr.bf16.mxu0 %v842_v39  ;;  %v63_v58 = vld [vmem:[%s1477_s1 + $0x140] sm:$0xff]  ;;  %v64_v60 = vld [vmem:[%s1477_s1 + $0x148] sm:$0xff]  ;;  %v50_v62 = vld [vmem:[%s1477_s1 + $0xd8] sm:$0xff]  ;;  %v848_v3 = vpack.c.bf16 %v32_v57, %v31_v56 }
   0xf   :  { %873 = vmatpush3.bf16.msra.mxu1 %v872_v38  ;;  %v81_v1 = vld [vmem:[%s1477_s1 + $0x1d0] sm:$0xff]  ;;  %v82_v2 = vld [vmem:[%s1477_s1 + $0x1d8] sm:$0xff]  ;;  %v880_v4 = vpack.c.bf16 %v64_v60, %v63_v58  ;;  %v850_v5 = vpack.c.bf16 %v50_v62, %v49_v61  ;;  %v51_v11 = vld [vmem:[%s1477_s1 + $0xe0] sm:$0xff] }
  0x10   :  { %875 = vmatprep.subr.bf16.mxu1 %v874_v43  ;;  %v33_v6 = vld [vmem:[%s1477_s1 + $0x50] sm:$0xff]  ;;  %v34_v7 = vld [vmem:[%s1477_s1 + $0x58] sm:$0xff]  ;;  %v882_v9 = vpack.c.bf16 %v82_v2, %v81_v1  ;;  %v52_v12 = vld [vmem:[%s1477_s1 + $0xe8] sm:$0xff] }
  0x11   :  { %845 = vmatpush3.bf16.msra.mxu0 %v844_v51  ;;  %v65_v8 = vld [vmem:[%s1477_s1 + $0x150] sm:$0xff]  ;;  %v66_v10 = vld [vmem:[%s1477_s1 + $0x158] sm:$0xff]  ;;  %v83_v14 = vld [vmem:[%s1477_s1 + $0x1e0] sm:$0xff]  ;;  %v852_v16 = vpack.c.bf16 %v34_v7, %v33_v6  ;;  %v854_v19 = vpack.c.bf16 %v52_v12, %v51_v11 }
  0x12   :  { %847 = vmatprep.subr.bf16.mxu0 %v846_v55  ;;  %v84_v15 = vld [vmem:[%s1477_s1 + $0x1e8] sm:$0xff]  ;;  %v35_v17 = vld [vmem:[%s1477_s1 + $0x60] sm:$0xff]  ;;  %v884_v18 = vpack.c.bf16 %v66_v10, %v65_v8  ;;  %v53_v25 = vld [vmem:[%s1477_s1 + $0xf0] sm:$0xff] }
  0x13   :  { %877 = vmatpush3.bf16.msra.mxu1 %v876_v54  ;;  %v36_v20 = vld [vmem:[%s1477_s1 + $0x68] sm:$0xff]  ;;  %v67_v21 = vld [vmem:[%s1477_s1 + $0x160] sm:$0xff]  ;;  %v886_v23 = vpack.c.bf16 %v84_v15, %v83_v14  ;;  %v54_v26 = vld [vmem:[%s1477_s1 + $0xf8] sm:$0xff] }
  0x14   :  { %879 = vmatprep.subr.bf16.mxu1 %v878_v59  ;;  %v21_v22 = vld [vmem:[%s1476_s0] sm:$0xff]  ;;  %v68_v24 = vld [vmem:[%s1477_s1 + $0x168] sm:$0xff]  ;;  %v85_v29 = vld [vmem:[%s1477_s1 + $0x1f0] sm:$0xff]  ;;  %v856_v31 = vpack.c.bf16 %v36_v20, %v35_v17  ;;  %v858_v35 = vpack.c.bf16 %v54_v26, %v53_v25 }
  0x15   :  { %849 = vmatpush3.bf16.msra.mxu0 %v848_v3  ;;  %v167_v27 = vrot.slane %v21_v22, %v1186_v13  ;;  %v160_v28 = vcombine.high %v21_v22, %v21_v22  ;;  %v86_v30 = vld [vmem:[%s1477_s1 + $0x1f8] sm:$0xff]  ;;  %v888_v34 = vpack.c.bf16 %v68_v24, %v67_v21  ;;  %v37_v36 = vld [vmem:[%s1477_s1 + $0x70] sm:$0xff]  ;;  %v103_v41 = vld [vmem:[%s1477_s1 + $0x280] sm:$0xff] }
  0x16   :  { %851 = vmatprep.subr.bf16.mxu0 %v850_v5  ;;  %v38_v37 = vld [vmem:[%s1477_s1 + $0x78] sm:$0xff]  ;;  %v69_v38 = vld [vmem:[%s1477_s1 + $0x170] sm:$0xff]  ;;  %v890_v39 = vpack.c.bf16 %v86_v30, %v85_v29  ;;  %v104_v42 = vld [vmem:[%s1477_s1 + $0x288] sm:$0xff] }
  0x17   :  { %881 = vmatpush3.bf16.msra.mxu1 %v880_v4  ;;  %v175_v32 = vcombine.high %v167_v27, %v167_v27  ;;  %v174_v33 = vrot.slane %v160_v28, %v1186_v13  ;;  %v70_v40 = vld [vmem:[%s1477_s1 + $0x178] sm:$0xff]  ;;  %v135_v44 = vld [vmem:[%s1477_s1 + $0x380] sm:$0xff]  ;;  %v136_v45 = vld [vmem:[%s1477_s1 + $0x388] sm:$0xff]  ;;  %v860_v46 = vpack.c.bf16 %v38_v37, %v37_v36  ;;  %v894_v48 = vpack.c.bf16 %v104_v42, %v103_v41 }
  0x18   :  { %883 = vmatprep.subr.bf16.mxu1 %v882_v9  ;;  %v892_v47 = vpack.c.bf16 %v70_v40, %v69_v38  ;;  %v87_v49 = vld [vmem:[%s1477_s1 + $0x200] sm:$0xff]  ;;  %v88_v50 = vld [vmem:[%s1477_s1 + $0x208] sm:$0xff]  ;;  %v926_v52 = vpack.c.bf16 %v136_v45, %v135_v44  ;;  %v105_v54 = vld [vmem:[%s1477_s1 + $0x290] sm:$0xff] }
  0x19   :  { %853 = vmatpush3.bf16.msra.mxu0 %v852_v16  ;;  %266 = vmatprep.mubr.f32.mxu0 %v175_v32  ;;  %v176_v43 = vcombine.high %v174_v33, %v174_v33  ;;  %v119_v51 = vld [vmem:[%s1477_s1 + $0x300] sm:$0xff]  ;;  %v120_v53 = vld [vmem:[%s1477_s1 + $0x308] sm:$0xff]  ;;  %v106_v55 = vld [vmem:[%s1477_s1 + $0x298] sm:$0xff]  ;;  %v896_v58 = vpack.c.bf16 %v88_v50, %v87_v49 }
  0x1a   :  { %855 = vmatprep.subr.bf16.mxu0 %v854_v19  ;;  %v137_v56 = vld [vmem:[%s1477_s1 + $0x390] sm:$0xff]  ;;  %v138_v57 = vld [vmem:[%s1477_s1 + $0x398] sm:$0xff]  ;;  %v928_v59 = vpack.c.bf16 %v120_v53, %v119_v51  ;;  %v898_v60 = vpack.c.bf16 %v106_v55, %v105_v54  ;;  %v107_v2 = vld [vmem:[%s1477_s1 + $0x2a0] sm:$0xff] }
  0x1b   :  { %885 = vmatpush3.bf16.msra.mxu1 %v884_v18  ;;  %336 = vmatprep.mubr.f32.mxu1 %v176_v43  ;;  %v89_v61 = vld [vmem:[%s1477_s1 + $0x210] sm:$0xff]  ;;  %v90_v62 = vld [vmem:[%s1477_s1 + $0x218] sm:$0xff]  ;;  %v930_v0 = vpack.c.bf16 %v138_v57, %v137_v56  ;;  %v108_v3 = vld [vmem:[%s1477_s1 + $0x2a8] sm:$0xff] }
  0x1c   :  { %887 = vmatprep.subr.bf16.mxu1 %v886_v23  ;;  %v121_v63 = vld [vmem:[%s1477_s1 + $0x310] sm:$0xff]  ;;  %v122_v1 = vld [vmem:[%s1477_s1 + $0x318] sm:$0xff]  ;;  %v139_v4 = vld [vmem:[%s1477_s1 + $0x3a0] sm:$0xff]  ;;  %v900_v6 = vpack.c.bf16 %v90_v62, %v89_v61  ;;  %v902_v8 = vpack.c.bf16 %v108_v3, %v107_v2 }
  0x1d   :  { %857 = vmatpush3.bf16.msra.mxu0 %v856_v31  ;;  %v140_v5 = vld [vmem:[%s1477_s1 + $0x3a8] sm:$0xff]  ;;  %v932_v7 = vpack.c.bf16 %v122_v1, %v121_v63  ;;  %v91_v9 = vld [vmem:[%s1477_s1 + $0x220] sm:$0xff]  ;;  %v109_v15 = vld [vmem:[%s1477_s1 + $0x2b0] sm:$0xff] }
  0x1e   :  { %859 = vmatprep.subr.bf16.mxu0 %v858_v35  ;;  %v92_v10 = vld [vmem:[%s1477_s1 + $0x228] sm:$0xff]  ;;  %v123_v11 = vld [vmem:[%s1477_s1 + $0x320] sm:$0xff]  ;;  %v934_v12 = vpack.c.bf16 %v140_v5, %v139_v4  ;;  %v110_v16 = vld [vmem:[%s1477_s1 + $0x2b8] sm:$0xff] }
  0x1f   :  { %889 = vmatpush3.bf16.msra.mxu1 %v888_v34  ;;  %v124_v14 = vld [vmem:[%s1477_s1 + $0x328] sm:$0xff]  ;;  %v141_v17 = vld [vmem:[%s1477_s1 + $0x3b0] sm:$0xff]  ;;  %v142_v18 = vld [vmem:[%s1477_s1 + $0x3b8] sm:$0xff]  ;;  %v904_v19 = vpack.c.bf16 %v92_v10, %v91_v9  ;;  %v906_v22 = vpack.c.bf16 %v110_v16, %v109_v15 }
  0x20   :  { %891 = vmatprep.subr.bf16.mxu1 %v890_v39  ;;  %v93_v20 = vld [vmem:[%s1477_s1 + $0x230] sm:$0xff]  ;;  %v936_v21 = vpack.c.bf16 %v124_v14, %v123_v11  ;;  %v94_v23 = vld [vmem:[%s1477_s1 + $0x238] sm:$0xff]  ;;  %v938_v26 = vpack.c.bf16 %v142_v18, %v141_v17  ;;  %v112_v28 = vld [vmem:[%s1477_s1 + $0x2c8] sm:$0xff] }
  0x21   :  { %861 = vmatpush3.bf16.msra.mxu0 %v860_v46  ;;  %v125_v24 = vld [vmem:[%s1477_s1 + $0x330] sm:$0xff]  ;;  %v126_v25 = vld [vmem:[%s1477_s1 + $0x338] sm:$0xff]  ;;  %v143_v29 = vld [vmem:[%s1477_s1 + $0x3c0] sm:$0xff] }
  0x22   :  { %895 = vmatprep.subr.bf16.mxu0 %v894_v48  ;;  %v144_v30 = vld [vmem:[%s1477_s1 + $0x3c8] sm:$0xff] }
  0x23   :  { %893 = vmatpush3.bf16.msra.mxu1 %v892_v47  ;;  %v22_v31 = vld [vmem:[%s1476_s0 + $0x8] sm:$0xff] }
  0x24   :  { %927 = vmatprep.subr.bf16.mxu1 %v926_v52  ;;  %267 = vmatmul.mubr.f32.vlgmr.msra.gmra.mrb[0].mxu0 %v167_v27  ;;  %v111_v27 = vld [vmem:[%s1477_s1 + $0x2c0] sm:$0xff] }
  0x25   :  { %897 = vmatpush3.bf16.msra.mxu0 %v896_v58 }
  0x26   :  { %337 = vmatmul.mubr.f32.vlgmr.msra.gmra.mrb[0].mxu1 %v174_v33  ;;  %899 = vmatprep.subr.bf16.mxu0 %v898_v60 }
  0x27   :  { %929 = vmatpush3.bf16.msra.mxu1 %v928_v59 }
  0x28   :  { %931 = vmatprep.subr.bf16.mxu1 %v930_v0 }
  0x29   :  { %901 = vmatpush3.bf16.msra.mxu0 %v900_v6 }
  0x2a   :  { %903 = vmatprep.subr.bf16.mxu0 %v902_v8 }
  0x2b   :  { %933 = vmatpush3.bf16.msra.mxu1 %v932_v7 }
  0x2c   :  { %935 = vmatprep.subr.bf16.mxu1 %v934_v12 }
  0x2d   :  { %10 = vsyncpa [#allocation3], 0  ;;  %905 = vmatpush3.bf16.msra.mxu0 %v904_v19  ;;  %v908_v32 = vpack.c.bf16 %v94_v23, %v93_v20  ;;  %v1347_v33 = vrot.slane %v22_v31, %v1186_v13  ;;  %v177_v34 = vcombine.high %v22_v31, %v22_v31  ;;  %v940_v35 = vpack.c.bf16 %v126_v25, %v125_v24  ;;  %v95_v37 = vld [vmem:[%s1477_s1 + $0x240] sm:$0xff]  ;;  %v96_v38 = vld [vmem:[%s1477_s1 + $0x248] sm:$0xff]  ;;  %s1005_s15 = smov [#allocation2]  }
  0x2e   :  { %907 = vmatprep.subr.bf16.mxu0 %v906_v22  ;;  %v910_v36 = vpack.c.bf16 %v112_v28, %v111_v27  ;;  %v127_v39 = vld [vmem:[%s1477_s1 + $0x340] sm:$0xff]  ;;  %v942_v40 = vpack.c.bf16 %v144_v30, %v143_v29  ;;  %v128_v41 = vld [vmem:[%s1477_s1 + $0x348] sm:$0xff]  ;;  %v113_v42 = vld [vmem:[%s1477_s1 + $0x2d0] sm:$0xff]  ;;  %v912_v48 = vpack.c.bf16 %v96_v38, %v95_v37  ;;  %v1002_v22 = vmov 0.0|0.0   ;;  %s647_s16 = sshll.u32 %s1005_s15, 4  ;;  %s648_s16 = int_to_ptr.vmem [resolvable:$true] %s647_s16 }
  0x2f   :  { %937 = vmatpush3.bf16.msra.mxu1 %v936_v21  ;;  %v114_v43 = vld [vmem:[%s1477_s1 + $0x2d8] sm:$0xff]  ;;  %v192_v44 = vcombine.high %v1347_v33, %v1347_v33  ;;  %v191_v45 = vrot.slane %v177_v34, %v1186_v13  ;;  %v145_v46 = vld [vmem:[%s1477_s1 + $0x3d0] sm:$0xff]  ;;  %v944_v50 = vpack.c.bf16 %v128_v41, %v127_v39  ;;  %v115_v56 = vld [vmem:[%s1477_s1 + $0x2e0] sm:$0xff]  ;;  %vm1003_vm0 = vmmov 0   ;;  %s977_s17 = scalar_lea.vmem %s648_s16, 32  ;;  %p982_p1 = scmp.lt.s32.totalorder %s648_s16, %s648_s16 }
  0x30   :  { %939 = vmatprep.subr.bf16.mxu1 %v938_v26  ;;  %v146_v47 = vld [vmem:[%s1477_s1 + $0x3d8] sm:$0xff]  ;;  %v914_v51 = vpack.c.bf16 %v114_v43, %v113_v42  ;;  %v97_v13 = vld [vmem:[%s1477_s1 + $0x250] sm:$0xff]  ;;  %v116_v57 = vld [vmem:[%s1477_s1 + $0x2e8] sm:$0xff]  ;;  %v1004_v26 = vmov 0.0   ;;  %vm487_vm1 = vcmask 261120   ;;  %vm639_vm2 = vcmask 58368   ;;  %p978_p0 = scmp.ne.s32.totalorder %s648_s16, %s977_s17  ;;  %p983_p2 = scmp.lt.s32.totalorder %s977_s17, %s977_s17 }
  0x31   :  { %909 = vmatpush3.bf16.msra.mxu0 %v908_v32  ;;  %406 = vmatprep.mubr.f32.mxu0 %v192_v44  ;;  %v193_v49 = vcombine.high %v191_v45, %v191_v45  ;;  %v98_v52 = vld [vmem:[%s1477_s1 + $0x258] sm:$0xff]  ;;  %v129_v53 = vld [vmem:[%s1477_s1 + $0x350] sm:$0xff]  ;;  %v946_v54 = vpack.c.bf16 %v146_v47, %v145_v46  ;;  %v147_v58 = vld [vmem:[%s1477_s1 + $0x3e0] sm:$0xff]  ;;  %v918_v62 = vpack.c.bf16 %v116_v57, %v115_v56 }
  0x32   :  { %911 = vmatprep.subr.bf16.mxu0 %v910_v36  ;;  %v130_v55 = vld [vmem:[%s1477_s1 + $0x358] sm:$0xff]  ;;  %v148_v59 = vld [vmem:[%s1477_s1 + $0x3e8] sm:$0xff]  ;;  %v916_v60 = vpack.c.bf16 %v98_v52, %v97_v13  ;;  %v99_v63 = vld [vmem:[%s1477_s1 + $0x260] sm:$0xff]  ;;  %p984_p3 = por %p983_p2, %p982_p1 }
  0x33   :  { %941 = vmatpush3.bf16.msra.mxu1 %v940_v35  ;;  %476 = vmatprep.mubr.f32.mxu1 %v193_v49  ;;  %v948_v61 = vpack.c.bf16 %v130_v55, %v129_v53  ;;  %v100_v0 = vld [vmem:[%s1477_s1 + $0x268] sm:$0xff]  ;;  %v131_v1 = vld [vmem:[%s1477_s1 + $0x360] sm:$0xff]  ;;  %v950_v2 = vpack.c.bf16 %v148_v59, %v147_v58  ;;  %v117_v4 = vld [vmem:[%s1477_s1 + $0x2f0] sm:$0xff] }
  0x34   :  { %943 = vmatprep.subr.bf16.mxu1 %v942_v40  ;;  %v132_v3 = vld [vmem:[%s1477_s1 + $0x368] sm:$0xff]  ;;  %v118_v5 = vld [vmem:[%s1477_s1 + $0x2f8] sm:$0xff]  ;;  %v149_v6 = vld [vmem:[%s1477_s1 + $0x3f0] sm:$0xff]  ;;  %v920_v8 = vpack.c.bf16 %v100_v0, %v99_v63  ;;  %p985_p4 = pnand %p984_p3, %p978_p0 }
  0x35   :  { %913 = vmatpush3.bf16.msra.mxu0 %v912_v48  ;;  %v150_v7 = vld [vmem:[%s1477_s1 + $0x3f8] sm:$0xff]  ;;  %v952_v9 = vpack.c.bf16 %v132_v3, %v131_v1  ;;  %v922_v10 = vpack.c.bf16 %v118_v5, %v117_v4  ;;  %v101_v11 = vld [vmem:[%s1477_s1 + $0x270] sm:$0xff]  ;;  %v483_v19 = vld [vmem:[%s1479_s3] sm:$0xff] }
  0x36   :  { %915 = vmatprep.subr.bf16.mxu0 %v914_v51  ;;  %v102_v12 = vld [vmem:[%s1477_s1 + $0x278] sm:$0xff]  ;;  %v954_v14 = vpack.c.bf16 %v150_v7, %v149_v6  ;;  %v133_v15 = vld [vmem:[%s1477_s1 + $0x370] sm:$0xff]  ;;  %v484_v20 = vld [vmem:[%s1479_s3 + $0x8] sm:$0xff] }
  0x37   :  { %945 = vmatpush3.bf16.msra.mxu1 %v944_v50  ;;  %v134_v16 = vld [vmem:[%s1477_s1 + $0x378] sm:$0xff]  ;;  %v924_v17 = vpack.c.bf16 %v102_v12, %v101_v11  ;;  %v959_v21 = vpack.c.bf16 %v484_v20, %v483_v19  ;;  %v485_v23 = vld [vmem:[%s1479_s3 + $0x10] sm:$0xff]  ;;  %v562_v27 = vld [vmem:[%s1480_s4] sm:$0xff] }
  0x38   :  { %947 = vmatprep.subr.bf16.mxu1 %v946_v54  ;;  %v956_v18 = vpack.c.bf16 %v134_v16, %v133_v15  ;;  %v486_v24 = vld [vmem:[%s1479_s3 + $0x18] sm:$0xff]  ;;  %v563_v28 = vld [vmem:[%s1480_s4 + $0x8] sm:$0xff]  ;;  %v655_v31 = vld [vmem:[%s1478_s2] ss:$0 sm:$0xff] }
  0x39   :  { %917 = vmatpush3.bf16.msra.mxu0 %v916_v60  ;;  %v962_v25 = vpack.c.bf16 %v486_v24, %v485_v23  ;;  %v965_v29 = vpack.c.bf16 %v563_v28, %v562_v27  ;;  %v564_v48 = vld [vmem:[%s1480_s4 + $0x10] sm:$0xff]  ;;  %v565_v49 = vld [vmem:[%s1480_s4 + $0x18] sm:$0xff] }
  0x3a   :  { %919 = vmatprep.subr.bf16.mxu0 %v918_v62  ;;  %v968_v50 = vpack.c.bf16 %v565_v49, %v564_v48 }
  0x3b   :  { %949 = vmatpush3.bf16.msra.mxu1 %v948_v61 }
  0x3c   :  { %951 = vmatprep.subr.bf16.mxu1 %v950_v2 }
  0x3d   :  { %921 = vmatpush3.bf16.msra.mxu0 %v920_v8 }
  0x3e   :  { %923 = vmatprep.subr.bf16.mxu0 %v922_v10 }
  0x3f   :  { %953 = vmatpush3.bf16.msra.mxu1 %v952_v9 }
  0x40   :  { %955 = vmatprep.subr.bf16.mxu1 %v954_v14 }
  0x41   :  { %925 = vmatpush3.bf16.msra.mxu0 %v924_v17 }
  0x42   :  { %958 = vmatprep.subr.bf16.mxu0 %v1002_v22 }
  0x43   :  { %957 = vmatpush3.bf16.msra.mxu1 %v956_v18 }
  0x44   :  { %407 = vmatmul.mubr.f32.vlgmr.msra.gmra.mrb[2].mxu0 %v1347_v33  ;;  %964 = vmatprep.subr.bf16.mxu1 %v1002_v22 }
  0x45   :  { %960 = vmatpush3.bf16.msra.mxu0 %v959_v21  ;;  %816 = vmatprep.mubr.msk.f32.mxu0 %vm1003_vm0, %v1004_v26 }
  0x46   :  { %477 = vmatmul.mubr.f32.vlgmr.msra.gmra.mrb[2].mxu1 %v191_v45  ;;  %961 = vmatprep.subr.bf16.mxu0 %v1002_v22 }
  0x47   :  { %827 = vmatprep.mubr.msk.f32.mxu1 %vm1003_vm0, %v1004_v26  ;;  %966 = vmatpush3.bf16.msra.mxu1 %v965_v29 }
  0x48   :  { %967 = vmatprep.subr.bf16.mxu1 %v1002_v22 }
  0x49   :  { %963 = vmatpush3.bf16.msra.mxu0 %v962_v25 }
  0x4b   :  { %969 = vmatpush3.bf16.msra.mxu1 %v968_v50 }
  0xf7   :  { %v690_v30 = vpop.f32.mrb[0].mxu0 }
  0xf8   :  { %v691_v32 = vpop.f32.mrb[1].mxu0 }
  0xf9   :  { %v725_v33 = vpop.f32.mrb[0].mxu1  ;;  %v692_v34 = vadd.f32 %v691_v32, %v690_v30 }
  0xfa   :  { %v726_v35 = vpop.f32.mrb[1].mxu1 }
  0xfb   :  { %v727_v36 = vadd.f32 %v726_v35, %v725_v33  ;;  %v269_v37 = vadd.f32 %v692_v34, %v655_v31 }
  0xfd   :  { %v339_v38 = vadd.f32 %v727_v36, %v269_v37 }
 0x117   :  { %v760_v39 = vpop.f32.mrb[2].mxu0 }
 0x118   :  { %v761_v40 = vpop.f32.mrb[3].mxu0 }
 0x119   :  { %v795_v41 = vpop.f32.mrb[2].mxu1  ;;  %v762_v42 = vadd.f32 %v761_v40, %v760_v39 }
 0x11a   :  { %v796_v43 = vpop.f32.mrb[3].mxu1 }
 0x11b   :  { %v797_v44 = vadd.f32 %v796_v43, %v795_v41  ;;  %v409_v45 = vadd.f32 %v762_v42, %v339_v38 }
 0x11d   :  { %v479_v46 = vadd.f32 %v797_v44, %v409_v45 }
 0x11f   :  { %v482_v47 = vmax.f32 %v479_v46, 0.0 }
 0x121   :  { %817 = vmatmul.mubr.msk.f32.vlgmr.msra.gmra.mrb[4].mxu0 %vm487_vm1, %v482_v47 }
 0x1f4   :  { %v557_v51 = vpop.f32.mrb[4].mxu0 }
 0x1f5   :  { %v561_v13 = vmax.f32 %v557_v51, 0.0  ;;  %v818_v52 = vpop.f32.mrb[5].mxu0 }
 0x1f7   :  { %828 = vmatmul.mubr.msk.f32.vlgmr.msra.gmra.mrb[4].mxu1 %vm487_vm1, %v561_v13 }
 0x2ca   :  { %v635_v53 = vpop.f32.mrb[4].mxu1 }
 0x2cb   :  { %640 = vst.msk [vmem:[#allocation2] sm:$0x3] %vm639_vm2, %v635_v53  ;;  %v829_v54 = vpop.f32.mrb[5].mxu1 }
 0x2cc   :  { %988 = shalt.err (!%p985_p4)
}
 0x2cd   :  { %s989_s19 = scalar_lea.hbm %s1481_s5, 32 }
 0x2ce   :  { %p990_p5 = scmp.ne.s32.totalorder %s1481_s5, %s989_s19  ;;  %p993_p6 = scmp.lt.u32.totalorder %s989_s19, %s1481_s5 }
 0x2d0   :  { %p995_p7 = pnand %p993_p6, %p990_p5 }
 0x2d2   :  { %998 = shalt.err (!%p995_p7)
}
 0x2d3   :  { %650 = dma.vmem_to_hbm [thread:$0]  %s648_s16, 32, %s1481_s5, [#allocation3]  }
 0x2d4   :  { %999 = dma.done.wait [#allocation3], 32  }
 0x2d5   :  { %1000 = vsyncadd [#allocation3], 4294967264 }
 0x2d6   :  { %654 = vsyncpa [#allocation3], 1 }

</bundles_post_ra>
